<compile_context>
chip_gen: v5e
topology: v5e:2x2
jax: 0.10.0
libtpu: 0.0.40
codegen_flags: <defaults>
</compile_context>

<pallas_src>
import functools
import math

import jax
import jax.numpy as jnp
from jax import lax
from jax.experimental import pallas as pl
from jax.experimental.pallas import tpu as pltpu


# ----------------------------- tiling helper -----------------------------

def _pick_tile(n, max_tile=256):
    """Largest multiple-of-8 divisor of n that is <= max_tile; falls back to n (full)."""
    if n <= max_tile:
        return n
    for t in range(max_tile, 7, -8):
        if n % t == 0:
            return t
    return n


# ----------------------------- fused QKV projection kernel -----------------------------

def _qkv_kernel(xq_ref, xk_ref, xv_ref, w_ref, b_ref, oq_ref, ok_ref, ov_ref):
    # x*: (tm, K); w: (3, N, K) (PyTorch weight layout); b: (3, 1, N)
    for i, (x_ref, o_ref) in enumerate(
            ((xq_ref, oq_ref), (xk_ref, ok_ref), (xv_ref, ov_ref))):
        o_ref[...] = lax.dot_general(
            x_ref[...], w_ref[i], (((1,), (1,)), ((), ())),
            preferred_element_type=jnp.float32,
        ) + b_ref[i]


def pallas_qkv_proj(xq, xk, xv, w_stack, b_stack):
    M, K = xq.shape
    N = w_stack.shape[1]
    tm = _pick_tile(M, 256)
    spec_x = pl.BlockSpec((tm, K), lambda i: (i, 0))
    spec_o = pl.BlockSpec((tm, N), lambda i: (i, 0))
    return pl.pallas_call(
        _qkv_kernel,
        out_shape=(jax.ShapeDtypeStruct((M, N), jnp.float32),) * 3,
        grid=(M // tm,),
        in_specs=[
            spec_x, spec_x, spec_x,
            pl.BlockSpec((3, N, K), lambda i: (0, 0, 0)),   # weights stay resident
            pl.BlockSpec((3, 1, N), lambda i: (0, 0, 0)),
        ],
        out_specs=(spec_o, spec_o, spec_o),
        compiler_params=pltpu.CompilerParams(dimension_semantics=("parallel",)),
    )(xq, xk, xv, w_stack, b_stack)


# ----------------------------- output projection kernel -----------------------------

def _linear_kernel(x_ref, w_ref, b_ref, o_ref):
    o_ref[...] = lax.dot_general(
        x_ref[...], w_ref[...], (((1,), (1,)), ((), ())),
        preferred_element_type=jnp.float32,
    ) + b_ref[...]


def pallas_linear(x2d, w, b):
    M, K = x2d.shape
    N = w.shape[0]
    tm = _pick_tile(M, 256)
    return pl.pallas_call(
        _linear_kernel,
        out_shape=jax.ShapeDtypeStruct((M, N), jnp.float32),
        grid=(M // tm,),
        in_specs=[
            pl.BlockSpec((tm, K), lambda i: (i, 0)),
            pl.BlockSpec((N, K), lambda i: (0, 0)),
            pl.BlockSpec((1, N), lambda i: (0, 0)),
        ],
        out_specs=pl.BlockSpec((tm, N), lambda i: (i, 0)),
        compiler_params=pltpu.CompilerParams(dimension_semantics=("parallel",)),
    )(x2d, w, b.reshape(1, N))


# ----------------------------- attention kernel -----------------------------

def _softmax_last(x):
    x_max = jnp.max(x, axis=-1, keepdims=True)
    e = jnp.exp(x - x_max)
    return e / jnp.sum(e, axis=-1, keepdims=True)


def _attention_kernel(q_ref, k_ref, v_ref, mask_ref, gamma_ref, o_ref, *s_refs,
                      maxout, with_scores):
    # q: (1, tq, d_model); k/v: (1, S, d_model); mask: (tq, S); gamma: (n_heads,) in SMEM
    tq = q_ref.shape[1]
    S = k_ref.shape[1]
    d_model = q_ref.shape[2]
    n_heads = gamma_ref.shape[0]
    d_k = d_model // n_heads

    q_blk = q_ref[0]            # (tq, d_model)
    k_blk = k_ref[0]            # (S, d_model)
    v_blk = v_ref[0]            # (S, d_model)
    m = mask_ref[...]           # (tq, S)

    # ---- hoisted once per grid step (shared across heads) ----
    keep = m != 0
    bias = jnp.where(keep, jnp.float32(0.0), jnp.float32(-1e32))   # additive mask bias

    row_off = (pl.program_id(1) * tq).astype(jnp.float32)
    row = lax.broadcasted_iota(jnp.int32, (tq, S), 0).astype(jnp.float32) + row_off
    col = lax.broadcasted_iota(jnp.int32, (tq, S), 1).astype(jnp.float32)
    position_effect = jnp.abs(col - row)                            # |x1 - x2|

    # chunk size for the blocked cumsum (degenerates to S for small sequences)
    if S <= 256:
        chunk = S
    elif S % 256 == 0:
        chunk = 256
    elif S % 128 == 0:
        chunk = 128
    else:
        chunk = S
    tri = (lax.broadcasted_iota(jnp.int32, (chunk, chunk), 0)
           <= lax.broadcasted_iota(jnp.int32, (chunk, chunk), 1)).astype(jnp.float32)

    inv_sqrt_dk = jnp.float32(1.0 / math.sqrt(d_k))
    out_cols = []
    for h in range(n_heads):
        lo, hi = h * d_k, (h + 1) * d_k
        qh = q_blk[:, lo:hi]                       # (tq, d_k)
        kh = k_blk[:, lo:hi]                       # (S, d_k)
        vh = v_blk[:, lo:hi]                       # (S, d_k)

        # scores = q @ k^T / sqrt(d_k)
        scores = lax.dot_general(
            qh, kh, (((1,), (1,)), ((), ())), preferred_element_type=jnp.float32
        ) * inv_sqrt_dk

        # --- distance-decay ("gamma") effect (matches torch.no_grad() branch) ---
        scores_ = _softmax_last(scores + bias)

        # blocked cumsum along the key axis: per-chunk upper-tri matmul + running carry
        pieces = []
        carry = jnp.zeros((tq, 1), jnp.float32)
        for t in range(S // chunk):
            blk = scores_[:, t * chunk:(t + 1) * chunk]
            cs = jnp.dot(blk, tri, preferred_element_type=jnp.float32) + carry
            pieces.append(cs)
            carry = cs[:, chunk - 1:chunk]
        distcum = pieces[0] if len(pieces) == 1 else jnp.concatenate(pieces, axis=-1)

        disttotal = jnp.sum(scores_, axis=-1, keepdims=True)
        dist_scores = jnp.sqrt(jnp.maximum((disttotal - distcum) * position_effect, 0.0))
        g = jnp.abs(gamma_ref[h])                  # scalar from SMEM
        total_effect = jnp.clip(jnp.exp(dist_scores * (-g)),
                                jnp.float32(1e-5), jnp.float32(1e5))

        # --- masked softmax ---
        scores = _softmax_last(scores * total_effect + bias)
        scores = jnp.where(keep, scores, jnp.float32(0.0))

        if maxout:
            inv_max = pl.reciprocal(jnp.max(scores, axis=-1, keepdims=True), approx=True)
            scores = scores * jnp.minimum(inv_max, jnp.float32(5.0))

        # TODO(synk): nn.Dropout(0.2) on attention scores is identity in eval mode; omitted.

        out_cols.append(jnp.dot(scores, vh, preferred_element_type=jnp.float32))
        if with_scores:
            s_refs[0][0, h] = scores

    # single lane-dense store of all heads, already in (bs, S, d_model) layout
    o_ref[0] = out_cols[0] if n_heads == 1 else jnp.concatenate(out_cols, axis=-1)


# ----------------------------- module wrapper -----------------------------

def init_params(key, d_model, n_heads, kq_same=True):
    ks = jax.random.split(key, 5)

    def lin(k, out_f, in_f):
        bound = 1.0 / math.sqrt(in_f)
        w = jax.random.uniform(k, (out_f, in_f), jnp.float32, -bound, bound)
        b = jax.random.uniform(jax.random.fold_in(k, 1), (out_f,), jnp.float32, -bound, bound)
        return w, b

    qw, qb = lin(ks[0], d_model, d_model)
    if kq_same:
        kw, kb = qw, qb
    else:
        kw, kb = lin(ks[1], d_model, d_model)
    vw, vb = lin(ks[2], d_model, d_model)
    ow, ob = lin(ks[3], d_model, d_model)
    # xavier_uniform on (n_heads, 1, 1)
    g_bound = math.sqrt(6.0 / (1.0 + n_heads))
    gammas = jax.random.uniform(ks[4], (n_heads, 1, 1), jnp.float32, -g_bound, g_bound)
    # NOTE: MLP/MLP2/mse_loss of the PyTorch module are unused in forward(); not materialized.
    return dict(qw=qw, qb=qb, kw=kw, kb=kb, vw=vw, vb=vb, ow=ow, ob=ob, gammas=gammas)


def multi_head_attention(params, q, k, v, mask, n_heads, maxout=False, return_scores=True):
    bs, S, d_model = q.shape

    # fused, tiled Q/K/V projection (one pallas_call)
    w_stack = jnp.stack([params["qw"], params["kw"], params["vw"]])              # (3, N, K)
    b_stack = jnp.stack([params["qb"], params["kb"], params["vb"]])[:, None, :]  # (3, 1, N)
    qp, kp, vp = pallas_qkv_proj(
        q.reshape(bs * S, d_model), k.reshape(bs * S, d_model), v.reshape(bs * S, d_model),
        w_stack, b_stack)
    qp = qp.reshape(bs, S, d_model)
    kp = kp.reshape(bs, S, d_model)
    vp = vp.reshape(bs, S, d_model)

    mask2d = mask.reshape(S, S).astype(jnp.float32)
    gammas = params["gammas"].reshape(n_heads)

    tq = _pick_tile(S, 128)
    grid = (bs, S // tq)

    kernel = functools.partial(_attention_kernel, maxout=maxout, with_scores=return_scores)

    out_struct = jax.ShapeDtypeStruct((bs, S, d_model), jnp.float32)
    out_spec = pl.BlockSpec((1, tq, d_model), lambda b, i: (b, i, 0))
    if return_scores:
        out_shape = (out_struct, jax.ShapeDtypeStruct((bs, n_heads, S, S), jnp.float32))
        out_specs = (out_spec, pl.BlockSpec((1, n_heads, tq, S), lambda b, i: (b, 0, i, 0)))
    else:
        out_shape = out_struct
        out_specs = out_spec

    res = pl.pallas_call(
        kernel,
        out_shape=out_shape,
        grid=grid,
        in_specs=[
            pl.BlockSpec((1, tq, d_model), lambda b, i: (b, i, 0)),   # q tile
            pl.BlockSpec((1, S, d_model), lambda b, i: (b, 0, 0)),    # full K (resident per batch)
            pl.BlockSpec((1, S, d_model), lambda b, i: (b, 0, 0)),    # full V
            pl.BlockSpec((tq, S), lambda b, i: (i, 0)),               # mask rows for this q tile
            pl.BlockSpec(memory_space=pltpu.MemorySpace.SMEM),        # gammas (scalars)
        ],
        out_specs=out_specs,
        compiler_params=pltpu.CompilerParams(
            dimension_semantics=("parallel", "parallel")),
    )(qp, kp, vp, mask2d, gammas)

    if return_scores:
        out_h, scores = res
    else:
        out_h, scores = res, None

    # out_h is already (bs, S, n_heads*d_k) == (bs, S, d_model): concat is free
    output = pallas_linear(out_h.reshape(bs * S, d_model),
                           params["ow"], params["ob"]).reshape(bs, S, d_model)
    return output, scores


# ----------------------------- pure-JAX reference -----------------------------

def reference(params, q, k, v, mask, n_heads, maxout=False):
    bs, S, d_model = q.shape
    d_k = d_model // n_heads

    def lin(x, w, b):
        return x @ w.T + b

    qh = lin(q, params["qw"], params["qb"]).reshape(bs, S, n_heads, d_k).transpose(0, 2, 1, 3)
    kh = lin(k, params["kw"], params["kb"]).reshape(bs, S, n_heads, d_k).transpose(0, 2, 1, 3)
    vh = lin(v, params["vw"], params["vb"]).reshape(bs, S, n_heads, d_k).transpose(0, 2, 1, 3)

    scores = jnp.einsum("bhqd,bhkd->bhqk", qh, kh) / math.sqrt(d_k)
    m = mask.reshape(1, 1, S, S)
    neg = jnp.float32(-1e32)

    scores_ = jax.nn.softmax(jnp.where(m == 0, neg, scores), axis=-1)
    distcum = jnp.cumsum(scores_, axis=-1)
    disttotal = jnp.sum(scores_, axis=-1, keepdims=True)
    x1 = jnp.broadcast_to(jnp.arange(S, dtype=jnp.float32)[None, :], (S, S))
    x2 = x1.T
    pos = jnp.abs(x1 - x2)[None, None]
    dist = jnp.sqrt(jnp.maximum((disttotal - distcum) * pos, 0.0))
    gamma = -jnp.abs(params["gammas"])[None]  # (1, h, 1, 1)
    total_effect = jnp.clip(jnp.exp(dist * gamma), 1e-5, 1e5)
    scores = scores * total_effect
    scores = jnp.where(m == 0, neg, scores)
    scores = jax.nn.softmax(scores, axis=-1)
    scores = jnp.where(m == 0, 0.0, scores)
    if maxout:
        scale = jnp.minimum(1.0 / jnp.max(scores, axis=-1, keepdims=True), 5.0)
        scores = scores * scale
    out = jnp.einsum("bhqk,bhkd->bhqd", scores, vh)
    concat = out.transpose(0, 2, 1, 3).reshape(bs, S, d_model)
    output = lin(concat, params["ow"], params["ob"])
    return output, scores


if __name__ == "__main__":
    d_model, n_heads, bs, S = 32, 4, 2, 8

    key = jax.random.PRNGKey(0)
    kp, kq, kk, kv = jax.random.split(key, 4)
    params = init_params(kp, d_model, n_heads, kq_same=True)

    q = jax.random.normal(kq, (bs, S, d_model), jnp.float32)
    k = jax.random.normal(kk, (bs, S, d_model), jnp.float32)
    v = jax.random.normal(kv, (bs, S, d_model), jnp.float32)
    mask = jnp.tril(jnp.ones((S, S), jnp.float32)).reshape(1, 1, S, S)

    out, scores = multi_head_attention(params, q, k, v, mask, n_heads, maxout=False)
    (out, scores) = jax.block_until_ready((out, scores))

    ref_out, ref_scores = reference(params, q, k, v, mask, n_heads, maxout=False)
    assert out.shape == (bs, S, d_model) and scores.shape == (bs, n_heads, S, S)
    assert jnp.allclose(out, ref_out, atol=2e-3, rtol=2e-3)
    assert jnp.allclose(scores, ref_scores, atol=2e-3, rtol=2e-3)

    print("KERNEL_OK")
</pallas_src>

<mosaic_0001>
module attributes {stable_mosaic.version = 11 : i64} {
  func.func @_qkv_kernel(%arg0: i32, %arg1: memref<16x32xf32, #tpu.memory_space<vmem>>, %arg2: memref<16x32xf32, #tpu.memory_space<vmem>>, %arg3: memref<16x32xf32, #tpu.memory_space<vmem>>, %arg4: memref<3x32x32xf32, #tpu.memory_space<vmem>>, %arg5: memref<3x1x32xf32, #tpu.memory_space<vmem>>, %arg6: memref<16x32xf32, #tpu.memory_space<vmem>>, %arg7: memref<16x32xf32, #tpu.memory_space<vmem>>, %arg8: memref<16x32xf32, #tpu.memory_space<vmem>>) attributes {dimension_semantics = [#tpu.dimension_semantics<parallel>], iteration_bounds = array<i64: 1>, scalar_prefetch = 0 : i64, scratch_operands = 0 : i64, tpu.core_type = #tpu.core_type<tc>, window_params = [{transform_indices = @transform_0, window_bounds = array<i64: 16, 32>}, {transform_indices = @transform_1, window_bounds = array<i64: 16, 32>}, {transform_indices = @transform_2, window_bounds = array<i64: 16, 32>}, {pipeline_mode = #tpu.pipeline_mode<synchronous>, transform_indices = @transform_3, window_bounds = array<i64: 3, 32, 32>}, {pipeline_mode = #tpu.pipeline_mode<synchronous>, transform_indices = @transform_4, window_bounds = array<i64: 3, 1, 32>}, {transform_indices = @transform_5, window_bounds = array<i64: 16, 32>}, {transform_indices = @transform_6, window_bounds = array<i64: 16, 32>}, {transform_indices = @transform_7, window_bounds = array<i64: 16, 32>}]} {
    %c0 = arith.constant 0 : index
    %c0_0 = arith.constant 0 : index
    %0 = vector.load %arg1[%c0, %c0_0] : memref<16x32xf32, #tpu.memory_space<vmem>>, vector<16x32xf32>
    %c0_1 = arith.constant 0 : index
    %c0_2 = arith.constant 0 : index
    %c0_3 = arith.constant 0 : index
    %1 = vector.load %arg4[%c0_1, %c0_2, %c0_3] : memref<3x32x32xf32, #tpu.memory_space<vmem>>, vector<1x32x32xf32>
    %2 = vector.shape_cast %1 : vector<1x32x32xf32> to vector<32x32xf32>
    %cst = arith.constant dense<0.000000e+00> : vector<16x32xf32>
    %3 = tpu.matmul %0, %2, %cst {dimension_numbers = #tpu.dot_dimension_numbers<[1], [1], [0], [0], [0, 0, 1, 0], [], []>} : vector<16x32xf32>, vector<32x32xf32>, vector<16x32xf32> -> vector<16x32xf32>
    %c0_4 = arith.constant 0 : index
    %c0_5 = arith.constant 0 : index
    %c0_6 = arith.constant 0 : index
    %4 = vector.load %arg5[%c0_4, %c0_5, %c0_6] : memref<3x1x32xf32, #tpu.memory_space<vmem>>, vector<1x1x32xf32>
    %5 = vector.shape_cast %4 : vector<1x1x32xf32> to vector<1x32xf32>
    %6 = vector.broadcast %5 : vector<1x32xf32> to vector<16x32xf32>
    %7 = arith.addf %3, %6 : vector<16x32xf32>
    %c0_7 = arith.constant 0 : index
    %c0_8 = arith.constant 0 : index
    %8 = vector.load %arg6[%c0_7, %c0_8] : memref<16x32xf32, #tpu.memory_space<vmem>>, vector<16x32xf32>
    tpu.vector_store %arg6[%c0_7, %c0_8], %7 {strides = array<i32>} : memref<16x32xf32, #tpu.memory_space<vmem>>, vector<16x32xf32>,
    %c0_9 = arith.constant 0 : index
    %c0_10 = arith.constant 0 : index
    %9 = vector.load %arg2[%c0_9, %c0_10] : memref<16x32xf32, #tpu.memory_space<vmem>>, vector<16x32xf32>
    %c1 = arith.constant 1 : index
    %c0_11 = arith.constant 0 : index
    %c0_12 = arith.constant 0 : index
    %10 = vector.load %arg4[%c1, %c0_11, %c0_12] : memref<3x32x32xf32, #tpu.memory_space<vmem>>, vector<1x32x32xf32>
    %11 = vector.shape_cast %10 : vector<1x32x32xf32> to vector<32x32xf32>
    %cst_13 = arith.constant dense<0.000000e+00> : vector<16x32xf32>
    %12 = tpu.matmul %9, %11, %cst_13 {dimension_numbers = #tpu.dot_dimension_numbers<[1], [1], [0], [0], [0, 0, 1, 0], [], []>} : vector<16x32xf32>, vector<32x32xf32>, vector<16x32xf32> -> vector<16x32xf32>
    %c1_14 = arith.constant 1 : index
    %c0_15 = arith.constant 0 : index
    %c0_16 = arith.constant 0 : index
    %13 = vector.load %arg5[%c1_14, %c0_15, %c0_16] : memref<3x1x32xf32, #tpu.memory_space<vmem>>, vector<1x1x32xf32>
    %14 = vector.shape_cast %13 : vector<1x1x32xf32> to vector<1x32xf32>
    %15 = vector.broadcast %14 : vector<1x32xf32> to vector<16x32xf32>
    %16 = arith.addf %12, %15 : vector<16x32xf32>
    %c0_17 = arith.constant 0 : index
    %c0_18 = arith.constant 0 : index
    %17 = vector.load %arg7[%c0_17, %c0_18] : memref<16x32xf32, #tpu.memory_space<vmem>>, vector<16x32xf32>
    tpu.vector_store %arg7[%c0_17, %c0_18], %16 {strides = array<i32>} : memref<16x32xf32, #tpu.memory_space<vmem>>, vector<16x32xf32>,
    %c0_19 = arith.constant 0 : index
    %c0_20 = arith.constant 0 : index
    %18 = vector.load %arg3[%c0_19, %c0_20] : memref<16x32xf32, #tpu.memory_space<vmem>>, vector<16x32xf32>
    %c2 = arith.constant 2 : index
    %c0_21 = arith.constant 0 : index
    %c0_22 = arith.constant 0 : index
    %19 = vector.load %arg4[%c2, %c0_21, %c0_22] : memref<3x32x32xf32, #tpu.memory_space<vmem>>, vector<1x32x32xf32>
    %20 = vector.shape_cast %19 : vector<1x32x32xf32> to vector<32x32xf32>
    %cst_23 = arith.constant dense<0.000000e+00> : vector<16x32xf32>
    %21 = tpu.matmul %18, %20, %cst_23 {dimension_numbers = #tpu.dot_dimension_numbers<[1], [1], [0], [0], [0, 0, 1, 0], [], []>} : vector<16x32xf32>, vector<32x32xf32>, vector<16x32xf32> -> vector<16x32xf32>
    %c2_24 = arith.constant 2 : index
    %c0_25 = arith.constant 0 : index
    %c0_26 = arith.constant 0 : index
    %22 = vector.load %arg5[%c2_24, %c0_25, %c0_26] : memref<3x1x32xf32, #tpu.memory_space<vmem>>, vector<1x1x32xf32>
    %23 = vector.shape_cast %22 : vector<1x1x32xf32> to vector<1x32xf32>
    %24 = vector.broadcast %23 : vector<1x32xf32> to vector<16x32xf32>
    %25 = arith.addf %21, %24 : vector<16x32xf32>
    %c0_27 = arith.constant 0 : index
    %c0_28 = arith.constant 0 : index
    %26 = vector.load %arg8[%c0_27, %c0_28] : memref<16x32xf32, #tpu.memory_space<vmem>>, vector<16x32xf32>
    tpu.vector_store %arg8[%c0_27, %c0_28], %25 {strides = array<i32>} : memref<16x32xf32, #tpu.memory_space<vmem>>, vector<16x32xf32>,
    return
  }
  func.func @transform_0(%arg0: i32) -> (i32, i32) {
    %c0_i32 = arith.constant 0 : i32
    %c0_i32_0 = arith.constant 0 : i32
    return %arg0, %c0_i32 : i32, i32
  }
  func.func @transform_1(%arg0: i32) -> (i32, i32) {
    %c0_i32 = arith.constant 0 : i32
    %c0_i32_0 = arith.constant 0 : i32
    return %arg0, %c0_i32 : i32, i32
  }
  func.func @transform_2(%arg0: i32) -> (i32, i32) {
    %c0_i32 = arith.constant 0 : i32
    %c0_i32_0 = arith.constant 0 : i32
    return %arg0, %c0_i32 : i32, i32
  }
  func.func @transform_3(%arg0: i32) -> (i32, i32, i32) {
    %c0_i32 = arith.constant 0 : i32
    %c0_i32_0 = arith.constant 0 : i32
    %c0_i32_1 = arith.constant 0 : i32
    %c0_i32_2 = arith.constant 0 : i32
    return %c0_i32, %c0_i32_0, %c0_i32_1 : i32, i32, i32
  }
  func.func @transform_4(%arg0: i32) -> (i32, i32, i32) {
    %c0_i32 = arith.constant 0 : i32
    %c0_i32_0 = arith.constant 0 : i32
    %c0_i32_1 = arith.constant 0 : i32
    %c0_i32_2 = arith.constant 0 : i32
    return %c0_i32, %c0_i32_0, %c0_i32_1 : i32, i32, i32
  }
  func.func @transform_5(%arg0: i32) -> (i32, i32) {
    %c0_i32 = arith.constant 0 : i32
    %c0_i32_0 = arith.constant 0 : i32
    return %arg0, %c0_i32 : i32, i32
  }
  func.func @transform_6(%arg0: i32) -> (i32, i32) {
    %c0_i32 = arith.constant 0 : i32
    %c0_i32_0 = arith.constant 0 : i32
    return %arg0, %c0_i32 : i32, i32
  }
  func.func @transform_7(%arg0: i32) -> (i32, i32) {
    %c0_i32 = arith.constant 0 : i32
    %c0_i32_0 = arith.constant 0 : i32
    return %arg0, %c0_i32 : i32, i32
  }
}

</mosaic_0001>

<bundles_post_ra>
// kernel: tpu_custom_call.1
= control target key start
LH: loop header
LB: loop body
LE: loop exit
PB: predicated region body
PF: predicated region fallthrough
CT: control target
= control target key end

     0   :  { %13 = vsyncpa [#allocation3], 0  ;;  %s650_s0 = inlined_call_operand.hbm [shape: f32[16,32], index: 0, kind: input, shape index: {}]   ;;  %s651_s1 = inlined_call_operand.hbm [shape: f32[16,32], index: 1, kind: input, shape index: {}]   ;;  %s652_s2 = inlined_call_operand.hbm [shape: f32[16,32], index: 2, kind: input, shape index: {}]   ;;  %s653_s3 = inlined_call_operand.hbm [shape: f32[3,32,32], index: 3, kind: input, shape index: {}]   ;;  %s654_s4 = inlined_call_operand.vmem [shape: f32[3,1,32], index: 4, kind: input, shape index: {}]   ;;  %s655_s5 = inlined_call_operand.hbm [shape: f32[16,32], index: 5, kind: output, shape index: {0}]   ;;  %s656_s6 = inlined_call_operand.hbm [shape: f32[16,32], index: 6, kind: output, shape index: {1}]   ;;  %s657_s7 = inlined_call_operand.hbm [shape: f32[16,32], index: 7, kind: output, shape index: {2}]  }
   0x1   :  { %14 = vsyncpa [#allocation6], 0 }
   0x2   :  { %15 = vsyncpa [#allocation9], 0 }
   0x3   :  { %16 = vsyncpa [#allocation4], 0 }
   0x4   :  { %17 = vsyncpa [#allocation12], 0  ;;  %s35_s26 = sshll.u32 %s651_s1, 4  ;;  %s522_s27 = smov [#allocation5]   ;;  %s36_s26 = int_to_ptr.hbm [resolvable:$true] %s35_s26 }
   0x5   :  { %s37_s28 = sshll.u32 %s522_s27, 4  ;;  %s22_s8 = sshll.u32 %s650_s0, 4  ;;  %s38_s28 = int_to_ptr.vmem [resolvable:$true] %s37_s28  ;;  %s23_s8 = int_to_ptr.hbm [resolvable:$true] %s22_s8 }
   0x6   :  { %s523_s9 = smov 128   ;;  %s524_s10 = smov 8  }
   0x7   :  { %43 = dma.hbm_to_vmem [thread:$0]  %s36_s26, 256, %s38_s28, [#allocation6], %s523_s9, %s523_s9, %s524_s10  }
   0x8   :  { %s525_s11 = smov [#allocation2]   ;;  %s48_s1 = sshll.u32 %s652_s2, 4  ;;  %s49_s1 = int_to_ptr.hbm [resolvable:$true] %s48_s1 }
   0x9   :  { %s24_s12 = sshll.u32 %s525_s11, 4  ;;  %s61_s16 = sshll.u32 %s653_s3, 4  ;;  %s25_s12 = int_to_ptr.vmem [resolvable:$true] %s24_s12  ;;  %s62_s16 = int_to_ptr.hbm [resolvable:$true] %s61_s16 }
   0xa   :  { %30 = dma.hbm_to_vmem [thread:$0]  %s23_s8, 256, %s25_s12, [#allocation3], %s523_s9, %s523_s9, %s524_s10  }
   0xb   :  { %s526_s17 = smov [#allocation7]   ;;  %s527_s19 = smov [#allocation8]  }
   0xc   :  { %s50_s18 = sshll.u32 %s526_s17, 4  ;;  %s63_s2 = sshll.u32 %s527_s19, 4  ;;  %s51_s18 = int_to_ptr.vmem [resolvable:$true] %s50_s18  ;;  %s64_s2 = int_to_ptr.vmem [resolvable:$true] %s63_s2 }
   0xd   :  { %56 = dma.hbm_to_vmem [thread:$0]  %s49_s1, 256, %s51_s18, [#allocation6], %s523_s9, %s523_s9, %s524_s10  }
   0xe   :  { %69 = dma.hbm_to_vmem [thread:$0]  %s62_s16, 1536, %s64_s2, [#allocation9], %s523_s9, %s523_s9, %s524_s10  }
   0xf   :  { %512 = dma.done.wait [#allocation3], 256  }
  0x10   :  { %513 = vsyncadd [#allocation3], 4294967040 }
  0x11   :  { %514 = dma.done.wait [#allocation6], 512  }
  0x12   :  { %515 = vsyncadd [#allocation6], 4294966784 }
  0x13   :  { %516 = dma.done.wait [#allocation9], 1536  }
  0x14   :  { %517 = vsyncadd [#allocation9], 4294965760  ;;  %vm98_vm0 = vcmask 261120   ;;  %v203_v0 = vld [vmem:[#allocation8 + $0x58] sm:$0xff]  ;;  %v202_v3 = vld [vmem:[#allocation8 + $0x50] sm:$0xff]  ;;  %s528_s25 = smov [#allocation10]  }
  0x15   :  { %v148_v1 = vld [vmem:[#allocation8 + $0x38] sm:$0xff]  ;;  %322 = vmatpush.xpose.msk.msra.mxu2 %vm98_vm0, %v203_v0  ;;  %v147_v4 = vld [vmem:[#allocation8 + $0x30] sm:$0xff]  ;;  %v201_v6 = vld [vmem:[#allocation8 + $0x48] sm:$0xff]  ;;  %s256_s26 = sshll.u32 %s528_s25, 4  ;;  %s258_s29 = sshll.u32 %s655_s5, 4  ;;  %s257_s26 = int_to_ptr.vmem [resolvable:$true] %s256_s26  ;;  %s259_s29 = int_to_ptr.hbm [resolvable:$true] %s258_s29 }
  0x16   :  { %315 = vmatpush.xpose.msk.msra.mxu1 %vm98_vm0, %v148_v1  ;;  %v93_v2 = vld [vmem:[#allocation8 + $0x18] sm:$0xff]  ;;  %v92_v5 = vld [vmem:[#allocation8 + $0x10] sm:$0xff]  ;;  %v146_v7 = vld [vmem:[#allocation8 + $0x28] sm:$0xff]  ;;  %s529_s30 = smov [#allocation11]   ;;  %s271_s13 = sshll.u32 %s656_s6, 4  ;;  %s272_s13 = int_to_ptr.hbm [resolvable:$true] %s271_s13 }
  0x17   :  { %328 = vmatpush.xpose.msk.msra.mxu3 %vm98_vm0, %v93_v2  ;;  %308 = vmatpush.xpose.msk.msra.mxu0 %vm98_vm0, %v93_v2  ;;  %v91_v8 = vld [vmem:[#allocation8 + $0x8] sm:$0xff]  ;;  %v200_v9 = vld [vmem:[#allocation8 + $0x40] sm:$0xff]  ;;  %v197_v12 = vld [vmem:[#allocation7] sm:$0xff]  ;;  %s269_s8 = sshll.u32 %s529_s30, 4  ;;  %s284_s0 = sshll.u32 %s657_s7, 4  ;;  %s270_s8 = int_to_ptr.vmem [resolvable:$true] %s269_s8  ;;  %s285_s0 = int_to_ptr.hbm [resolvable:$true] %s284_s0 }
  0x18   :  { %v145_v10 = vld [vmem:[#allocation8 + $0x20] sm:$0xff]  ;;  %v89_v14 = vld [vmem:[#allocation2 + $0x8] sm:$0xff]  ;;  %v88_v15 = vld [vmem:[#allocation2] sm:$0xff] }
  0x19   :  { %323 = vmatpush.xpose.msk.msra.mxu2 %vm98_vm0, %v202_v3  ;;  %v90_v11 = vld [vmem:[#allocation8] sm:$0xff]  ;;  %v198_v16 = vld [vmem:[#allocation7 + $0x8] sm:$0xff]  ;;  %v143_v17 = vld [vmem:[#allocation5 + $0x8] sm:$0xff] }
  0x1a   :  { %316 = vmatpush.xpose.msk.msra.mxu1 %vm98_vm0, %v147_v4  ;;  %v142_v13 = vld [vmem:[#allocation5] sm:$0xff]  ;;  %v341_v18 = vld [vmem:[%s654_s4 + $0x1] ss:$0 sm:$0xff]  ;;  %v343_v19 = vld [vmem:[%s654_s4] ss:$0 sm:$0xff] }
  0x1b   :  { %329 = vmatpush.xpose.msk.msra.mxu3 %vm98_vm0, %v92_v5  ;;  %309 = vmatpush.xpose.msk.msra.mxu0 %vm98_vm0, %v92_v5  ;;  %v342_v24 = vld [vmem:[%s654_s4 + $0x2] ss:$0 sm:$0xff]  ;;  %s530_s4 = smov [#allocation13]  }
  0x1c   :  { %s282_s5 = sshll.u32 %s530_s4, 4  ;;  %s283_s5 = int_to_ptr.vmem [resolvable:$true] %s282_s5 }
  0x1d   :  { %324 = vmatpush.xpose.msk.msra.mxu2 %vm98_vm0, %v201_v6 }
  0x1e   :  { %317 = vmatpush.xpose.msk.msra.mxu1 %vm98_vm0, %v146_v7 }
  0x1f   :  { %330 = vmatpush.xpose.msk.msra.mxu3 %vm98_vm0, %v91_v8  ;;  %310 = vmatpush.xpose.msk.msra.mxu0 %vm98_vm0, %v91_v8 }
  0x21   :  { %325 = vmatpush.xpose.msk.msra.mxu2 %vm98_vm0, %v200_v9 }
  0x22   :  { %318 = vmatpush.xpose.msk.msra.mxu1 %vm98_vm0, %v145_v10 }
  0x23   :  { %331 = vmatpush.xpose.msk.msra.mxu3 %vm98_vm0, %v90_v11  ;;  %311 = vmatpush.xpose.msk.msra.mxu0 %vm98_vm0, %v90_v11 }
  0x24   :  { %326 = vmatmul.msk.f32.vlgmr.msra.gmra.mxu2 %vm98_vm0, %v197_v12 }
  0x25   :  { %319 = vmatmul.msk.f32.vlgmr.msra.gmra.mxu1 %vm98_vm0, %v142_v13 }
  0x26   :  { %313 = vmatmul.msk.f32.vlgmr.msra.gmra.mxu3 %vm98_vm0, %v89_v14  ;;  %312 = vmatmul.msk.f32.vlgmr.msra.gmra.mxu0 %vm98_vm0, %v88_v15 }
  0x2c   :  { %327 = vmatmul.msk.f32.gmra.mxu2 %vm98_vm0, %v198_v16 }
  0x2d   :  { %320 = vmatmul.msk.f32.gmra.mxu1 %vm98_vm0, %v143_v17 }
  0xa2   :  { %v189_v20 = vpop.f32.mrf.mxu1 }
  0xa3   :  { %v190_v21 = vadd.f32 %v341_v18, %v189_v20  ;;  %v134_v22 = vpop.f32.mrf.mxu0 }
  0xa4   :  { %v135_v23 = vadd.f32 %v343_v19, %v134_v22 }
  0xa5   :  { %195 = vst.msk [vmem:[#allocation11] sm:$0xff] %vm98_vm0, %v190_v21 }
  0xa6   :  { %140 = vst.msk [vmem:[#allocation10] sm:$0xff] %vm98_vm0, %v135_v23 }
  0xa7   :  { %v244_v25 = vpop.f32.mrf.mxu2 }
  0xa8   :  { %v245_v26 = vadd.f32 %v342_v24, %v244_v25 }
  0xa9   :  { %v137_v27 = vpop.f32.mrf.mxu3 }
  0xaa   :  { %v192_v28 = vpop.f32.mrf.mxu1  ;;  %v138_v29 = vadd.f32 %v343_v19, %v137_v27  ;;  %250 = vst.msk [vmem:[#allocation13] sm:$0xff] %vm98_vm0, %v245_v26 }
  0xab   :  { %v193_v30 = vadd.f32 %v341_v18, %v192_v28 }
  0xac   :  { %141 = vst.msk [vmem:[#allocation10 + $0x8] sm:$0xff] %vm98_vm0, %v138_v29 }
  0xad   :  { %196 = vst.msk [vmem:[#allocation11 + $0x8] sm:$0xff] %vm98_vm0, %v193_v30  ;;  %264 = dma.vmem_to_hbm [thread:$0]  %s257_s26, 256, %s259_s29, [#allocation4], %s523_s9, %s523_s9, %s524_s10  }
  0xae   :  { %277 = dma.vmem_to_hbm [thread:$0]  %s270_s8, 256, %s272_s13, [#allocation12], %s523_s9, %s523_s9, %s524_s10  }
  0xaf   :  { %v247_v31 = vpop.f32.mrf.mxu2 }
  0xb0   :  { %v248_v32 = vadd.f32 %v342_v24, %v247_v31 }
  0xb2   :  { %251 = vst.msk [vmem:[#allocation13 + $0x8] sm:$0xff] %vm98_vm0, %v248_v32 }
  0xb3   :  { %290 = dma.vmem_to_hbm [thread:$0]  %s283_s5, 256, %s285_s0, [#allocation12], %s523_s9, %s523_s9, %s524_s10  }
  0xb4   :  { %518 = dma.done.wait [#allocation4], 256  }
  0xb5   :  { %519 = vsyncadd [#allocation4], 4294967040 }
  0xb6   :  { %520 = dma.done.wait [#allocation12], 512  }
  0xb7   :  { %521 = vsyncadd [#allocation12], 4294966784 }
  0xb8   :  { %303 = vsyncpa [#allocation3], 1 }
  0xb9   :  { %304 = vsyncpa [#allocation6], 1 }
  0xba   :  { %305 = vsyncpa [#allocation9], 1 }
  0xbb   :  { %306 = vsyncpa [#allocation4], 1 }
  0xbc   :  { %307 = vsyncpa [#allocation12], 1 }

</bundles_post_ra>
